<compile_context>
chip_gen: v6e
topology: v6e:2x2x1
jax: 0.10.0
libtpu: 0.0.40
codegen_flags: <defaults>
</compile_context>

<pallas_src>
import jax
import jax.numpy as jnp
from jax.experimental import pallas as pl
from jax.experimental.pallas import tpu as pltpu

_LANE = 128
_BN_EPS = 1e-5


# ----------------------------- Pallas kernel -------------------------------

def _make_fused_mlp_kernel(n_hidden):
    """Build a kernel for `n_hidden` (Linear->ReLU->BN) layers + final Linear.

    Ref layout (positional):
      x_ref,
      [W_0, p_0, W_1, p_1, ..., W_{n_hidden-1}, p_{n_hidden-1}],
      W_last, b_last,
      o_ref
    where p_i is a (3, N) pack of rows [bias, gamma, beta].
    """

    def kernel(*refs):
        x_ref = refs[0]
        o_ref = refs[-1]

        y = x_ref[...]  # f32 activation, lives in vregs/VMEM the whole time
        for i in range(n_hidden):
            w = refs[1 + 2 * i][...]
            p = refs[2 + 2 * i][...]            # (3, N): bias, gamma, beta
            lhs = y.astype(w.dtype) if w.dtype == jnp.bfloat16 else y
            y = jnp.dot(lhs, w, preferred_element_type=jnp.float32)
            y = y + p[0:1, :]                   # bias
            y = jnp.maximum(y, 0.0)             # ReLU
            # BatchNorm1d (training mode), one-pass stats over the batch axis.
            mean = jnp.mean(y, axis=0, keepdims=True)
            mean_sq = jnp.mean(y * y, axis=0, keepdims=True)
            var = mean_sq - mean * mean
            y = (y - mean) * jax.lax.rsqrt(var + _BN_EPS)
            y = y * p[1:2, :] + p[2:3, :]       # gamma, beta

        w_last = refs[1 + 2 * n_hidden][...]
        b_last = refs[2 + 2 * n_hidden][...]
        lhs = y.astype(w_last.dtype) if w_last.dtype == jnp.bfloat16 else y
        o_ref[...] = (
            jnp.dot(lhs, w_last, preferred_element_type=jnp.float32) + b_last
        )

    return kernel


def _full_spec(shape):
    # Whole-array block (no grid): always legal, tensors here are tiny.
    return pl.BlockSpec(shape, lambda: tuple(0 for _ in shape))


# ------------------------------- Wrapper ------------------------------------

def _round_up(n, m):
    return ((n + m - 1) // m) * m


def _pad_to(a, shape):
    return jnp.pad(a, [(0, s - d) for d, s in zip(a.shape, shape)])


def mlp_readout_forward(x, fc_params, bn_params, dropout=0.0,
                        use_bf16_matmul=False):
    """Fused MLPReadout forward. fc_params[i] = (W(in,out), b(1,out));
    bn_params[i] = (gamma(1,out), beta(1,out)) for every FC layer but the last."""
    if dropout != 0.0:
        # TODO(synk): training-mode F.dropout path not implemented (module
        # default dropout=0 uses the BatchNorm path below).
        raise NotImplementedError("dropout > 0 path not implemented")

    n_hidden = len(fc_params) - 1
    batch = x.shape[0]
    out_dim = fc_params[-1][0].shape[1]

    w_dtype = jnp.bfloat16 if use_bf16_matmul else jnp.float32

    # Zero-pad feature dims to multiples of 128 (lane-dense vregs/stores).
    in_p = _round_up(x.shape[1], _LANE)
    x_p = _pad_to(x.astype(jnp.float32), (batch, in_p))

    args = [x_p]
    in_specs = [_full_spec(x_p.shape)]

    prev_p = in_p
    for i in range(n_hidden):
        w, b = fc_params[i]
        gamma, beta = bn_params[i]
        d_p = _round_up(w.shape[1], _LANE)
        w_p = _pad_to(w.astype(w_dtype), (prev_p, d_p))
        # Pack bias/gamma/beta into one (3, d_p) tensor -> one DMA per layer.
        p_pack = jnp.concatenate(
            [_pad_to(b.astype(jnp.float32), (1, d_p)),
             _pad_to(gamma.astype(jnp.float32), (1, d_p)),
             _pad_to(beta.astype(jnp.float32), (1, d_p))], axis=0)
        args += [w_p, p_pack]
        in_specs += [_full_spec(w_p.shape), _full_spec(p_pack.shape)]
        prev_p = d_p

    w_last, b_last = fc_params[-1]
    out_p = _round_up(out_dim, _LANE)
    w_last_p = _pad_to(w_last.astype(w_dtype), (prev_p, out_p))
    b_last_p = _pad_to(b_last.astype(jnp.float32), (1, out_p))
    args += [w_last_p, b_last_p]
    in_specs += [_full_spec(w_last_p.shape), _full_spec(b_last_p.shape)]

    out_padded = pl.pallas_call(
        _make_fused_mlp_kernel(n_hidden),
        out_shape=jax.ShapeDtypeStruct((batch, out_p), jnp.float32),
        in_specs=in_specs,
        out_specs=_full_spec((batch, out_p)),
        compiler_params=pltpu.CompilerParams(
            vmem_limit_bytes=32 * 1024 * 1024),
    )(*args)

    # Lane-dense padded store inside the kernel; slice real outputs here.
    return out_padded[:, :out_dim]


# ------------------------------ Parameter glue ------------------------------

def init_mlp_readout_params(key, input_dim, hidden_dim, output_dim, n_layers=2,
                            agg_dims=None):
    """Deterministic init mimicking nn.Linear defaults (U(-1/sqrt(fan_in), .))."""
    dims = [input_dim] + [hidden_dim] * n_layers
    if agg_dims is not None:
        dims += list(agg_dims)
    dims += [output_dim]

    fc_params = []
    for i in range(len(dims) - 1):
        key, kw, kb = jax.random.split(key, 3)
        bound = 1.0 / float(dims[i]) ** 0.5
        w = jax.random.uniform(kw, (dims[i], dims[i + 1]), jnp.float32,
                               -bound, bound)
        b = jax.random.uniform(kb, (1, dims[i + 1]), jnp.float32, -bound, bound)
        fc_params.append((w, b))

    # BatchNorm1d defaults: gamma = 1, beta = 0 (one per FC layer except last).
    bn_params = [
        (jnp.ones((1, dims[i + 1]), jnp.float32),
         jnp.zeros((1, dims[i + 1]), jnp.float32))
        for i in range(len(dims) - 2)
    ]
    return fc_params, bn_params


# Pure-JAX reference (same math, no Pallas) for a sanity check.
def _reference_forward(x, fc_params, bn_params):
    y = x
    for layer_id in range(len(fc_params) - 1):
        w, b = fc_params[layer_id]
        gamma, beta = bn_params[layer_id]
        y = jnp.maximum(y @ w + b, 0.0)
        mean = jnp.mean(y, axis=0, keepdims=True)
        var = jnp.mean(jnp.square(y - mean), axis=0, keepdims=True)
        y = (y - mean) * jax.lax.rsqrt(var + _BN_EPS) * gamma + beta
    w_last, b_last = fc_params[-1]
    return y @ w_last + b_last


# ----------------------------------- main -----------------------------------

if __name__ == "__main__":
    key = jax.random.PRNGKey(0)

    # Config 1: module defaults (n_layers=2, no agg layers, dropout=0).
    input_dim, hidden_dim, output_dim, n_layers = 32, 32, 1, 2
    batch = 8
    key, kx, kp = jax.random.split(key, 3)
    x = jax.random.normal(kx, (batch, input_dim), jnp.float32)
    fc_params, bn_params = init_mlp_readout_params(
        kp, input_dim, hidden_dim, output_dim, n_layers=n_layers)

    out = jax.block_until_ready(mlp_readout_forward(x, fc_params, bn_params))
    ref = _reference_forward(x, fc_params, bn_params)
    assert out.shape == (batch, output_dim)
    assert jnp.allclose(out, ref, atol=1e-4, rtol=1e-4)

    # Config 2: with aggregation layers (exercise the general fused kernel).
    key, kx2, kp2 = jax.random.split(key, 3)
    x2 = jax.random.normal(kx2, (batch, input_dim), jnp.float32)
    fc2, bn2 = init_mlp_readout_params(
        kp2, input_dim, hidden_dim, output_dim, n_layers=n_layers,
        agg_dims=[16, 8])
    out2 = jax.block_until_ready(mlp_readout_forward(x2, fc2, bn2))
    ref2 = _reference_forward(x2, fc2, bn2)
    assert out2.shape == (batch, output_dim)
    assert jnp.allclose(out2, ref2, atol=1e-4, rtol=1e-4)

    print("KERNEL_OK")
</pallas_src>

<mosaic_0001>
module attributes {stable_mosaic.version = 11 : i64} {
  func.func @kernel(%arg0: memref<8x128xf32, #tpu.memory_space<vmem>>, %arg1: memref<128x128xf32, #tpu.memory_space<vmem>>, %arg2: memref<3x128xf32, #tpu.memory_space<vmem>>, %arg3: memref<128x128xf32, #tpu.memory_space<vmem>>, %arg4: memref<3x128xf32, #tpu.memory_space<vmem>>, %arg5: memref<128x128xf32, #tpu.memory_space<vmem>>, %arg6: memref<1x128xf32, #tpu.memory_space<vmem>>, %arg7: memref<8x128xf32, #tpu.memory_space<vmem>>) attributes {dimension_semantics = [], scalar_prefetch = 0 : i64, scratch_operands = 0 : i64, tpu.core_type = #tpu.core_type<tc>} {
    %c0 = arith.constant 0 : index
    %c0_0 = arith.constant 0 : index
    %0 = vector.load %arg0[%c0, %c0_0] : memref<8x128xf32, #tpu.memory_space<vmem>>, vector<8x128xf32>
    %c0_1 = arith.constant 0 : index
    %c0_2 = arith.constant 0 : index
    %1 = vector.load %arg1[%c0_1, %c0_2] : memref<128x128xf32, #tpu.memory_space<vmem>>, vector<128x128xf32>
    %c0_3 = arith.constant 0 : index
    %c0_4 = arith.constant 0 : index
    %2 = vector.load %arg2[%c0_3, %c0_4] : memref<3x128xf32, #tpu.memory_space<vmem>>, vector<3x128xf32>
    %cst = arith.constant dense<0.000000e+00> : vector<8x128xf32>
    %3 = tpu.matmul %0, %1, %cst {dimension_numbers = #tpu.dot_dimension_numbers<[1], [0], [0], [1], [0, 0, 1, 1], [], []>} : vector<8x128xf32>, vector<128x128xf32>, vector<8x128xf32> -> vector<8x128xf32>
    %4 = vector.extract_strided_slice %2 {offsets = [0, 0], sizes = [1, 128], strides = [1, 1]} : vector<3x128xf32> to vector<1x128xf32>
    %5 = vector.broadcast %4 : vector<1x128xf32> to vector<8x128xf32>
    %6 = arith.addf %3, %5 : vector<8x128xf32>
    %cst_5 = arith.constant 0.000000e+00 : f32
    %7 = vector.broadcast %cst_5 : f32 to vector<8x128xf32>
    %8 = arith.maximumf %6, %7 : vector<8x128xf32>
    %cst_6 = arith.constant dense<0.000000e+00> : vector<128xf32>
    %9 = vector.multi_reduction <add>, %8, %cst_6 [0] : vector<8x128xf32> to vector<128xf32>
    %10 = vector.shape_cast %9 : vector<128xf32> to vector<1x128xf32>
    %cst_7 = arith.constant 8.000000e+00 : f32
    %11 = vector.broadcast %cst_7 : f32 to vector<1x128xf32>
    %12 = arith.divf %10, %11 : vector<1x128xf32>
    %13 = arith.mulf %8, %8 : vector<8x128xf32>
    %cst_8 = arith.constant dense<0.000000e+00> : vector<128xf32>
    %14 = vector.multi_reduction <add>, %13, %cst_8 [0] : vector<8x128xf32> to vector<128xf32>
    %15 = vector.shape_cast %14 : vector<128xf32> to vector<1x128xf32>
    %cst_9 = arith.constant 8.000000e+00 : f32
    %16 = vector.broadcast %cst_9 : f32 to vector<1x128xf32>
    %17 = arith.divf %15, %16 : vector<1x128xf32>
    %18 = arith.mulf %12, %12 : vector<1x128xf32>
    %19 = arith.subf %17, %18 : vector<1x128xf32>
    %20 = vector.broadcast %12 : vector<1x128xf32> to vector<8x128xf32>
    %21 = arith.subf %8, %20 : vector<8x128xf32>
    %cst_10 = arith.constant 9.99999974E-6 : f32
    %22 = vector.broadcast %cst_10 : f32 to vector<1x128xf32>
    %23 = arith.addf %19, %22 : vector<1x128xf32>
    %24 = math.rsqrt %23 : vector<1x128xf32>
    %25 = vector.broadcast %24 : vector<1x128xf32> to vector<8x128xf32>
    %26 = arith.mulf %21, %25 : vector<8x128xf32>
    %27 = vector.extract_strided_slice %2 {offsets = [1, 0], sizes = [1, 128], strides = [1, 1]} : vector<3x128xf32> to vector<1x128xf32>
    %28 = vector.broadcast %27 : vector<1x128xf32> to vector<8x128xf32>
    %29 = arith.mulf %26, %28 : vector<8x128xf32>
    %30 = vector.extract_strided_slice %2 {offsets = [2, 0], sizes = [1, 128], strides = [1, 1]} : vector<3x128xf32> to vector<1x128xf32>
    %31 = vector.broadcast %30 : vector<1x128xf32> to vector<8x128xf32>
    %32 = arith.addf %29, %31 : vector<8x128xf32>
    %c0_11 = arith.constant 0 : index
    %c0_12 = arith.constant 0 : index
    %33 = vector.load %arg3[%c0_11, %c0_12] : memref<128x128xf32, #tpu.memory_space<vmem>>, vector<128x128xf32>
    %c0_13 = arith.constant 0 : index
    %c0_14 = arith.constant 0 : index
    %34 = vector.load %arg4[%c0_13, %c0_14] : memref<3x128xf32, #tpu.memory_space<vmem>>, vector<3x128xf32>
    %cst_15 = arith.constant dense<0.000000e+00> : vector<8x128xf32>
    %35 = tpu.matmul %32, %33, %cst_15 {dimension_numbers = #tpu.dot_dimension_numbers<[1], [0], [0], [1], [0, 0, 1, 1], [], []>} : vector<8x128xf32>, vector<128x128xf32>, vector<8x128xf32> -> vector<8x128xf32>
    %36 = vector.extract_strided_slice %34 {offsets = [0, 0], sizes = [1, 128], strides = [1, 1]} : vector<3x128xf32> to vector<1x128xf32>
    %37 = vector.broadcast %36 : vector<1x128xf32> to vector<8x128xf32>
    %38 = arith.addf %35, %37 : vector<8x128xf32>
    %cst_16 = arith.constant 0.000000e+00 : f32
    %39 = vector.broadcast %cst_16 : f32 to vector<8x128xf32>
    %40 = arith.maximumf %38, %39 : vector<8x128xf32>
    %cst_17 = arith.constant dense<0.000000e+00> : vector<128xf32>
    %41 = vector.multi_reduction <add>, %40, %cst_17 [0] : vector<8x128xf32> to vector<128xf32>
    %42 = vector.shape_cast %41 : vector<128xf32> to vector<1x128xf32>
    %cst_18 = arith.constant 8.000000e+00 : f32
    %43 = vector.broadcast %cst_18 : f32 to vector<1x128xf32>
    %44 = arith.divf %42, %43 : vector<1x128xf32>
    %45 = arith.mulf %40, %40 : vector<8x128xf32>
    %cst_19 = arith.constant dense<0.000000e+00> : vector<128xf32>
    %46 = vector.multi_reduction <add>, %45, %cst_19 [0] : vector<8x128xf32> to vector<128xf32>
    %47 = vector.shape_cast %46 : vector<128xf32> to vector<1x128xf32>
    %cst_20 = arith.constant 8.000000e+00 : f32
    %48 = vector.broadcast %cst_20 : f32 to vector<1x128xf32>
    %49 = arith.divf %47, %48 : vector<1x128xf32>
    %50 = arith.mulf %44, %44 : vector<1x128xf32>
    %51 = arith.subf %49, %50 : vector<1x128xf32>
    %52 = vector.broadcast %44 : vector<1x128xf32> to vector<8x128xf32>
    %53 = arith.subf %40, %52 : vector<8x128xf32>
    %cst_21 = arith.constant 9.99999974E-6 : f32
    %54 = vector.broadcast %cst_21 : f32 to vector<1x128xf32>
    %55 = arith.addf %51, %54 : vector<1x128xf32>
    %56 = math.rsqrt %55 : vector<1x128xf32>
    %57 = vector.broadcast %56 : vector<1x128xf32> to vector<8x128xf32>
    %58 = arith.mulf %53, %57 : vector<8x128xf32>
    %59 = vector.extract_strided_slice %34 {offsets = [1, 0], sizes = [1, 128], strides = [1, 1]} : vector<3x128xf32> to vector<1x128xf32>
    %60 = vector.broadcast %59 : vector<1x128xf32> to vector<8x128xf32>
    %61 = arith.mulf %58, %60 : vector<8x128xf32>
    %62 = vector.extract_strided_slice %34 {offsets = [2, 0], sizes = [1, 128], strides = [1, 1]} : vector<3x128xf32> to vector<1x128xf32>
    %63 = vector.broadcast %62 : vector<1x128xf32> to vector<8x128xf32>
    %64 = arith.addf %61, %63 : vector<8x128xf32>
    %c0_22 = arith.constant 0 : index
    %c0_23 = arith.constant 0 : index
    %65 = vector.load %arg5[%c0_22, %c0_23] : memref<128x128xf32, #tpu.memory_space<vmem>>, vector<128x128xf32>
    %c0_24 = arith.constant 0 : index
    %c0_25 = arith.constant 0 : index
    %66 = vector.load %arg6[%c0_24, %c0_25] : memref<1x128xf32, #tpu.memory_space<vmem>>, vector<1x128xf32>
    %cst_26 = arith.constant dense<0.000000e+00> : vector<8x128xf32>
    %67 = tpu.matmul %64, %65, %cst_26 {dimension_numbers = #tpu.dot_dimension_numbers<[1], [0], [0], [1], [0, 0, 1, 1], [], []>} : vector<8x128xf32>, vector<128x128xf32>, vector<8x128xf32> -> vector<8x128xf32>
    %68 = vector.broadcast %66 : vector<1x128xf32> to vector<8x128xf32>
    %69 = arith.addf %67, %68 : vector<8x128xf32>
    %c0_27 = arith.constant 0 : index
    %c0_28 = arith.constant 0 : index
    %70 = vector.load %arg7[%c0_27, %c0_28] : memref<8x128xf32, #tpu.memory_space<vmem>>, vector<8x128xf32>
    tpu.vector_store %arg7[%c0_27, %c0_28], %69 {strides = array<i32>} : memref<8x128xf32, #tpu.memory_space<vmem>>, vector<8x128xf32>,
    return
  }
}

</mosaic_0001>

<bundles_post_ra>
// kernel: tpu_custom_call.1
= control target key start
LH: loop header
LB: loop body
LE: loop exit
PB: predicated region body
PF: predicated region fallthrough
CT: control target
= control target key end

     0   :  { %12 = vsyncpa [#allocation3], 0  ;;  %s903_s0 = inlined_call_operand.hbm [shape: f32[8,128], index: 0, kind: input, shape index: {}]   ;;  %s904_s1 = inlined_call_operand.hbm [shape: f32[128,128], index: 1, kind: input, shape index: {}]   ;;  %s905_s2 = inlined_call_operand.hbm [shape: f32[3,128], index: 2, kind: input, shape index: {}]   ;;  %s906_s3 = inlined_call_operand.hbm [shape: f32[128,128], index: 3, kind: input, shape index: {}]   ;;  %s907_s4 = inlined_call_operand.vmem [shape: f32[3,128], index: 4, kind: input, shape index: {}]   ;;  %s908_s5 = inlined_call_operand.hbm [shape: f32[128,128], index: 5, kind: input, shape index: {}]   ;;  %s909_s6 = inlined_call_operand.vmem [shape: f32[1,128], index: 6, kind: input, shape index: {}]   ;;  %s910_s7 = inlined_call_operand.hbm [shape: f32[8,128], index: 7, kind: output, shape index: {}]  }
   0x1   :  { %13 = vsyncpa [#allocation6], 0 }
   0x2   :  { %14 = vsyncpa [#allocation9], 0 }
   0x3   :  { %15 = vsyncpa [#allocation4], 0  ;;  %s749_s24 = smov [#allocation5]  }
   0x4   :  { %s31_s25 = sshll.u32 %s749_s24, 4  ;;  %s32_s25 = int_to_ptr.vmem [resolvable:$true] %s31_s25 }
   0x5   :  { %s629_s26 = scalar_lea.vmem %s32_s25, 2048  ;;  %p634_p1 = scmp.lt.s32.totalorder %s32_s25, %s32_s25 }
   0x6   :  { %p630_p0 = scmp.ne.s32.totalorder %s32_s25, %s629_s26  ;;  %p635_p2 = scmp.lt.s32.totalorder %s629_s26, %s629_s26 }
   0x8   :  { %p636_p3 = por %p635_p2, %p634_p1 }
   0xa   :  { %p637_p4 = pnand %p636_p3, %p630_p0 }
   0xc   :  { %640 = shalt.err (!%p637_p4)
}
   0xd   :  { %s750_s27 = smov 128   ;;  %s751_s28 = smov 8  }
   0xe   :  { %37 = dma.hbm_to_vmem [thread:$0]  %s904_s1, 2048, %s32_s25, [#allocation6], %s750_s27, %s750_s27, %s751_s28  }
   0xf   :  { %s752_s8 = smov [#allocation8]   ;;  %s753_s10 = smov [#allocation2]  }
  0x10   :  { %s53_s9 = sshll.u32 %s752_s8, 4  ;;  %s22_s11 = sshll.u32 %s753_s10, 4  ;;  %s54_s9 = int_to_ptr.vmem [resolvable:$true] %s53_s9  ;;  %s23_s11 = int_to_ptr.vmem [resolvable:$true] %s22_s11 }
  0x11   :  { %s649_s12 = scalar_lea.vmem %s54_s9, 2048  ;;  %p654_p6 = scmp.lt.s32.totalorder %s54_s9, %s54_s9 }
  0x12   :  { %p650_p5 = scmp.ne.s32.totalorder %s54_s9, %s649_s12  ;;  %p655_p7 = scmp.lt.s32.totalorder %s649_s12, %s649_s12 }
  0x14   :  { %p656_p8 = por %p655_p7, %p654_p6 }
  0x16   :  { %p657_p9 = pnand %p656_p8, %p650_p5 }
  0x18   :  { %660 = shalt.err (!%p657_p9)
}
  0x19   :  { %59 = dma.hbm_to_vmem [thread:$0]  %s906_s3, 2048, %s54_s9, [#allocation9], %s750_s27, %s750_s27, %s751_s28  }
  0x1a   :  { %s669_s1 = scalar_lea.vmem %s23_s11, 128  ;;  %p674_p11 = scmp.lt.s32.totalorder %s23_s11, %s23_s11 }
  0x1b   :  { %p670_p10 = scmp.ne.s32.totalorder %s23_s11, %s669_s1  ;;  %p675_p12 = scmp.lt.s32.totalorder %s669_s1, %s669_s1 }
  0x1d   :  { %p676_p13 = por %p675_p12, %p674_p11 }
  0x1f   :  { %p677_p0 = pnand %p676_p13, %p670_p10 }
  0x21   :  { %680 = shalt.err (!%p677_p0)
}
  0x22   :  { %25 = dma.hbm_to_vmem [thread:$0]  %s903_s0, 128, %s23_s11, [#allocation3]  }
  0x23   :  { %s754_s17 = smov [#allocation7]   ;;  %s755_s19 = smov [#allocation10]  }
  0x24   :  { %s44_s18 = sshll.u32 %s754_s17, 4  ;;  %s67_s20 = sshll.u32 %s755_s19, 4  ;;  %s45_s18 = int_to_ptr.vmem [resolvable:$true] %s44_s18  ;;  %s68_s20 = int_to_ptr.vmem [resolvable:$true] %s67_s20 }
  0x25   :  { %s689_s21 = scalar_lea.vmem %s45_s18, 64  ;;  %p694_p2 = scmp.lt.s32.totalorder %s45_s18, %s45_s18 }
  0x26   :  { %p690_p1 = scmp.ne.s32.totalorder %s45_s18, %s689_s21  ;;  %p695_p3 = scmp.lt.s32.totalorder %s689_s21, %s689_s21 }
  0x28   :  { %p696_p4 = por %p695_p3, %p694_p2 }
  0x2a   :  { %p697_p5 = pnand %p696_p4, %p690_p1 }
  0x2c   :  { %700 = shalt.err (!%p697_p5)
}
  0x2d   :  { %47 = dma.hbm_to_vmem [thread:$0]  %s905_s2, 64, %s45_s18, [#allocation6]  }
  0x2e   :  { %s709_s23 = scalar_lea.vmem %s68_s20, 2048  ;;  %p714_p7 = scmp.lt.s32.totalorder %s68_s20, %s68_s20 }
  0x2f   :  { %p710_p6 = scmp.ne.s32.totalorder %s68_s20, %s709_s23  ;;  %p715_p8 = scmp.lt.s32.totalorder %s709_s23, %s709_s23 }
  0x31   :  { %p716_p9 = por %p715_p8, %p714_p7 }
  0x33   :  { %p717_p10 = pnand %p716_p9, %p710_p6 }
  0x35   :  { %720 = shalt.err (!%p717_p10)
}
  0x36   :  { %73 = dma.hbm_to_vmem [thread:$0]  %s908_s5, 2048, %s68_s20, [#allocation9], %s750_s27, %s750_s27, %s751_s28  }
  0x37   :  { %741 = dma.done.wait [#allocation3], 128  }
  0x38   :  { %742 = vsyncadd [#allocation3], 4294967168 }
  0x39   :  { %743 = dma.done.wait [#allocation6], 2112  }
  0x3a   :  { %744 = vsyncadd [#allocation6], 4294965184 }
  0x3b   :  { %745 = dma.done.wait [#allocation9], 4096  }
  0x3c   :  { %746 = vsyncadd [#allocation9], 4294963200  ;;  %v756_v0 = vmov 0.0   ;;  %vm757_vm0 = vmmov 0   ;;  %v107_v1 = vld [vmem:[#allocation5 + $0x78] sm:$0xff]  ;;  %v106_v2 = vld [vmem:[#allocation5 + $0x70] sm:$0xff]  ;;  %v109_v34 = vlaneseq }
  0x3d   :  { %502 = vmatprep.subr.mxu0 %v756_v0  ;;  %534 = vmatprep.mubr.msk.f32.mxu0 %vm757_vm0, %v756_v0  ;;  %v105_v3 = vld [vmem:[#allocation5 + $0x68] sm:$0xff]  ;;  %v104_v4 = vld [vmem:[#allocation5 + $0x60] sm:$0xff]  ;;  %v103_v5 = vld [vmem:[#allocation5 + $0x58] sm:$0xff]  ;;  %s758_s26 = smov [#allocation11]  }
  0x3e   :  { %537 = vmatprep.subr.mxu1 %v756_v0  ;;  %569 = vmatprep.mubr.msk.f32.mxu1 %vm757_vm0, %v756_v0  ;;  %v102_v6 = vld [vmem:[#allocation5 + $0x50] sm:$0xff]  ;;  %v101_v7 = vld [vmem:[#allocation5 + $0x48] sm:$0xff]  ;;  %v100_v8 = vld [vmem:[#allocation5 + $0x40] sm:$0xff]  ;;  %v862_v35 = vshrl.u32 %v109_v34, 7  ;;  %s439_s27 = sshll.u32 %s758_s26, 4  ;;  %s440_s27 = int_to_ptr.vmem [resolvable:$true] %s439_s27 }
  0x3f   :  { %503 = vmatpush3.msra.mxu0 %v107_v1  ;;  %v99_v9 = vld [vmem:[#allocation5 + $0x38] sm:$0xff]  ;;  %v98_v10 = vld [vmem:[#allocation5 + $0x30] sm:$0xff]  ;;  %v97_v11 = vld [vmem:[#allocation5 + $0x28] sm:$0xff]  ;;  %s721_s28 = scalar_lea.vmem %s440_s27, 128  ;;  %p726_p12 = scmp.lt.s32.totalorder %s440_s27, %s440_s27 }
  0x40   :  { %504 = vmatprep.subr.mxu0 %v756_v0  ;;  %v96_v12 = vld [vmem:[#allocation5 + $0x20] sm:$0xff]  ;;  %v95_v13 = vld [vmem:[#allocation5 + $0x18] sm:$0xff]  ;;  %v94_v14 = vld [vmem:[#allocation5 + $0x10] sm:$0xff]  ;;  %v111_v36 = vsub.s32 0, %v862_v35  ;;  %v208_v61 = vsub.s32 1, %v862_v35  ;;  %v213_v62 = vsub.s32 2, %v862_v35  ;;  %p722_p11 = scmp.ne.s32.totalorder %s440_s27, %s721_s28  ;;  %p727_p13 = scmp.lt.s32.totalorder %s721_s28, %s721_s28 }
  0x41   :  { %505 = vmatpush3.msra.mxu0 %v106_v2  ;;  %v93_v15 = vld [vmem:[#allocation5 + $0x8] sm:$0xff]  ;;  %v92_v16 = vld [vmem:[#allocation5] sm:$0xff]  ;;  %v91_v17 = vld [vmem:[#allocation2] sm:$0xff] }
  0x42   :  { %506 = vmatprep.subr.mxu0 %v756_v0  ;;  %v231_v18 = vld [vmem:[#allocation8 + $0x78] sm:$0xff]  ;;  %v230_v19 = vld [vmem:[#allocation8 + $0x70] sm:$0xff]  ;;  %v229_v20 = vld [vmem:[#allocation8 + $0x68] sm:$0xff]  ;;  %p728_p0 = por %p727_p13, %p726_p12 }
  0x43   :  { %507 = vmatpush3.msra.mxu0 %v105_v3  ;;  %538 = vmatpush3.msra.mxu1 %v231_v18  ;;  %v228_v21 = vld [vmem:[#allocation8 + $0x60] sm:$0xff]  ;;  %v227_v22 = vld [vmem:[#allocation8 + $0x58] sm:$0xff]  ;;  %v226_v23 = vld [vmem:[#allocation8 + $0x50] sm:$0xff] }
  0x44   :  { %508 = vmatprep.subr.mxu0 %v756_v0  ;;  %539 = vmatprep.subr.mxu1 %v756_v0  ;;  %v225_v24 = vld [vmem:[#allocation8 + $0x48] sm:$0xff]  ;;  %v224_v25 = vld [vmem:[#allocation8 + $0x40] sm:$0xff]  ;;  %v223_v26 = vld [vmem:[#allocation8 + $0x38] sm:$0xff]  ;;  %p729_p1 = pnand %p728_p0, %p722_p11 }
  0x45   :  { %509 = vmatpush3.msra.mxu0 %v104_v4  ;;  %540 = vmatpush3.msra.mxu1 %v230_v19  ;;  %v222_v27 = vld [vmem:[#allocation8 + $0x30] sm:$0xff]  ;;  %v221_v28 = vld [vmem:[#allocation8 + $0x28] sm:$0xff]  ;;  %v220_v29 = vld [vmem:[#allocation8 + $0x20] sm:$0xff] }
  0x46   :  { %510 = vmatprep.subr.mxu0 %v756_v0  ;;  %541 = vmatprep.subr.mxu1 %v756_v0  ;;  %v219_v30 = vld [vmem:[#allocation8 + $0x18] sm:$0xff]  ;;  %v218_v31 = vld [vmem:[#allocation8 + $0x10] sm:$0xff]  ;;  %v217_v32 = vld [vmem:[#allocation8 + $0x8] sm:$0xff] }
  0x47   :  { %511 = vmatpush3.msra.mxu0 %v103_v5  ;;  %542 = vmatpush3.msra.mxu1 %v229_v20  ;;  %v216_v33 = vld [vmem:[#allocation8] sm:$0xff]  ;;  %v108_v37 = vld [vmem:[#allocation7] sm:$0x7]  ;;  %v341_v20 = vld [vmem:[#allocation10 + $0x10] sm:$0xff] }
  0x48   :  { %512 = vmatprep.subr.mxu0 %v756_v0  ;;  %543 = vmatprep.subr.mxu1 %v756_v0  ;;  %v112_v38 = vrot.slane %v108_v37, %v111_v36  ;;  %v209_v1 = vrot.slane %v108_v37, %v208_v61  ;;  %v214_v4 = vrot.slane %v108_v37, %v213_v62  ;;  %v343_v18 = vld [vmem:[#allocation10 + $0x20] sm:$0xff]  ;;  %v342_v19 = vld [vmem:[#allocation10 + $0x18] sm:$0xff] }
  0x49   :  { %513 = vmatpush3.msra.mxu0 %v102_v6  ;;  %544 = vmatpush3.msra.mxu1 %v228_v21  ;;  %v340_v21 = vld [vmem:[#allocation10 + $0x8] sm:$0xff] }
  0x4a   :  { %514 = vmatprep.subr.mxu0 %v756_v0  ;;  %545 = vmatprep.subr.mxu1 %v756_v0 }
  0x4b   :  { %515 = vmatpush3.msra.mxu0 %v101_v7  ;;  %546 = vmatpush3.msra.mxu1 %v227_v22  ;;  %v354_v7 = vld [vmem:[#allocation10 + $0x78] sm:$0xff]  ;;  %v339_v22 = vld [vmem:[#allocation10] sm:$0xff] }
  0x4c   :  { %516 = vmatprep.subr.mxu0 %v756_v0  ;;  %547 = vmatprep.subr.mxu1 %v756_v0 }
  0x4d   :  { %517 = vmatpush3.msra.mxu0 %v100_v8  ;;  %548 = vmatpush3.msra.mxu1 %v226_v23  ;;  %v353_v8 = vld [vmem:[#allocation10 + $0x70] sm:$0xff] }
  0x4e   :  { %518 = vmatprep.subr.mxu0 %v756_v0  ;;  %549 = vmatprep.subr.mxu1 %v756_v0  ;;  %v232_v23 = vld [vmem:[%s907_s4] sm:$0x7] }
  0x4f   :  { %519 = vmatpush3.msra.mxu0 %v99_v9  ;;  %550 = vmatpush3.msra.mxu1 %v225_v24  ;;  %v352_v9 = vld [vmem:[#allocation10 + $0x68] sm:$0xff]  ;;  %v236_v24 = vrot.slane %v232_v23, %v111_v36 }
  0x50   :  { %520 = vmatprep.subr.mxu0 %v756_v0  ;;  %551 = vmatprep.subr.mxu1 %v756_v0 }
  0x51   :  { %521 = vmatpush3.msra.mxu0 %v98_v10  ;;  %552 = vmatpush3.msra.mxu1 %v224_v25  ;;  %v351_v10 = vld [vmem:[#allocation10 + $0x60] sm:$0xff] }
  0x52   :  { %522 = vmatprep.subr.mxu0 %v756_v0  ;;  %553 = vmatprep.subr.mxu1 %v756_v0 }
  0x53   :  { %523 = vmatpush3.msra.mxu0 %v97_v11  ;;  %554 = vmatpush3.msra.mxu1 %v223_v26  ;;  %v350_v11 = vld [vmem:[#allocation10 + $0x58] sm:$0xff] }
  0x54   :  { %524 = vmatprep.subr.mxu0 %v756_v0  ;;  %555 = vmatprep.subr.mxu1 %v756_v0 }
  0x55   :  { %525 = vmatpush3.msra.mxu0 %v96_v12  ;;  %556 = vmatpush3.msra.mxu1 %v222_v27  ;;  %v349_v12 = vld [vmem:[#allocation10 + $0x50] sm:$0xff] }
  0x56   :  { %526 = vmatprep.subr.mxu0 %v756_v0  ;;  %557 = vmatprep.subr.mxu1 %v756_v0 }
  0x57   :  { %527 = vmatpush3.msra.mxu0 %v95_v13  ;;  %558 = vmatpush3.msra.mxu1 %v221_v28  ;;  %v348_v13 = vld [vmem:[#allocation10 + $0x48] sm:$0xff] }
  0x58   :  { %528 = vmatprep.subr.mxu0 %v756_v0  ;;  %559 = vmatprep.subr.mxu1 %v756_v0 }
  0x59   :  { %529 = vmatpush3.msra.mxu0 %v94_v14  ;;  %560 = vmatpush3.msra.mxu1 %v220_v29  ;;  %v347_v14 = vld [vmem:[#allocation10 + $0x40] sm:$0xff] }
  0x5a   :  { %530 = vmatprep.subr.mxu0 %v756_v0  ;;  %561 = vmatprep.subr.mxu1 %v756_v0 }
  0x5b   :  { %531 = vmatpush3.msra.mxu0 %v93_v15  ;;  %562 = vmatpush3.msra.mxu1 %v219_v30  ;;  %v346_v15 = vld [vmem:[#allocation10 + $0x38] sm:$0xff] }
  0x5c   :  { %532 = vmatprep.subr.mxu0 %v756_v0  ;;  %563 = vmatprep.subr.mxu1 %v756_v0 }
  0x5d   :  { %533 = vmatpush3.msra.mxu0 %v92_v16  ;;  %564 = vmatpush3.msra.mxu1 %v218_v31  ;;  %v345_v16 = vld [vmem:[#allocation10 + $0x30] sm:$0xff] }
  0x5e   :  { %535 = vmatmul.mubr.f32.vlgmr.msra.gmra.mxu0 %v91_v17  ;;  %572 = vmatprep.subr.mxu0 %v756_v0  ;;  %v344_v17 = vld [vmem:[#allocation10 + $0x28] sm:$0xff] }
  0x5f   :  { %604 = vmatprep.mubr.msk.f32.mxu0 %vm757_vm0, %v756_v0  ;;  %565 = vmatprep.subr.mxu1 %v756_v0 }
  0x60   :  { %566 = vmatpush3.msra.mxu1 %v217_v32  ;;  %573 = vmatpush3.msra.mxu0 %v354_v7 }
  0x61   :  { %567 = vmatprep.subr.mxu1 %v756_v0  ;;  %574 = vmatprep.subr.mxu0 %v756_v0 }
  0x62   :  { %568 = vmatpush3.msra.mxu1 %v216_v33  ;;  %575 = vmatpush3.msra.mxu0 %v353_v8 }
  0x63   :  { %576 = vmatprep.subr.mxu0 %v756_v0 }
  0x64   :  { %577 = vmatpush3.msra.mxu0 %v352_v9 }
  0x65   :  { %578 = vmatprep.subr.mxu0 %v756_v0 }
  0x66   :  { %579 = vmatpush3.msra.mxu0 %v351_v10 }
  0x67   :  { %580 = vmatprep.subr.mxu0 %v756_v0 }
  0x68   :  { %581 = vmatpush3.msra.mxu0 %v350_v11 }
  0x69   :  { %582 = vmatprep.subr.mxu0 %v756_v0 }
  0x6a   :  { %583 = vmatpush3.msra.mxu0 %v349_v12 }
  0x6b   :  { %584 = vmatprep.subr.mxu0 %v756_v0 }
  0x6c   :  { %585 = vmatpush3.msra.mxu0 %v348_v13 }
  0x6d   :  { %586 = vmatprep.subr.mxu0 %v756_v0 }
  0x6e   :  { %587 = vmatpush3.msra.mxu0 %v347_v14 }
  0x6f   :  { %588 = vmatprep.subr.mxu0 %v756_v0 }
  0x70   :  { %589 = vmatpush3.msra.mxu0 %v346_v15 }
  0x71   :  { %590 = vmatprep.subr.mxu0 %v756_v0 }
  0x72   :  { %591 = vmatpush3.msra.mxu0 %v345_v16 }
  0x73   :  { %592 = vmatprep.subr.mxu0 %v756_v0 }
  0x74   :  { %593 = vmatpush3.msra.mxu0 %v344_v17 }
  0x75   :  { %594 = vmatprep.subr.mxu0 %v756_v0 }
  0x76   :  { %595 = vmatpush3.msra.mxu0 %v343_v18 }
  0x77   :  { %596 = vmatprep.subr.mxu0 %v756_v0 }
  0x78   :  { %597 = vmatpush3.msra.mxu0 %v342_v19 }
  0x79   :  { %598 = vmatprep.subr.mxu0 %v756_v0 }
  0x7a   :  { %599 = vmatpush3.msra.mxu0 %v341_v20 }
  0x7b   :  { %600 = vmatprep.subr.mxu0 %v756_v0 }
  0x7c   :  { %601 = vmatpush3.msra.mxu0 %v340_v21 }
  0x7d   :  { %602 = vmatprep.subr.mxu0 %v756_v0 }
  0x7e   :  { %603 = vmatpush3.msra.mxu0 %v339_v22 }
 0x11e   :  { %v179_v39 = vpop.f32.mrf.mxu0 }
 0x11f   :  { %v180_v40 = vadd.f32 %v179_v39, %v112_v38 }
 0x120   :  { %v536_v41 = vpop.f32.mrf.mxu0 }
 0x121   :  { %v183_v42 = vmax.f32 %v180_v40, 0.0 }
 0x123   :  { %v184_v43 = vrot.slane %v183_v42, 4  ;;  %v192_v44 = vmul.f32 %v183_v42, %v183_v42 }
 0x125   :  { %v185_v45 = vadd.f32 %v184_v43, %v183_v42  ;;  %v193_v46 = vrot.slane %v192_v44, 4 }
 0x127   :  { %v186_v47 = vrot.slane %v185_v45, 2  ;;  %v194_v48 = vadd.f32 %v193_v46, %v192_v44 }
 0x129   :  { %v187_v49 = vadd.f32 %v186_v47, %v185_v45  ;;  %v195_v50 = vrot.slane %v194_v48, 2 }
 0x12b   :  { %v188_v51 = vrot.slane %v187_v49, 1  ;;  %v196_v52 = vadd.f32 %v195_v50, %v194_v48  ;;  %v332_v48 = vrot.slane %v232_v23, %v208_v61 }
 0x12d   :  { %v189_v53 = vadd.f32 %v188_v51, %v187_v49  ;;  %v197_v54 = vrot.slane %v196_v52, 1  ;;  %v337_v51 = vrot.slane %v232_v23, %v213_v62 }
 0x12f   :  { %v191_v55 = vmul.f32 0.125, %v189_v53  ;;  %v198_v56 = vadd.f32 %v197_v54, %v196_v52  ;;  %v450_v54 = vld [vmem:[%s909_s6] ss:$0 sm:$0xff] }
 0x131   :  { %v199_v57 = vmul.f32 0.125, %v198_v56  ;;  %v200_v58 = vmul.f32 %v191_v55, %v191_v55  ;;  %v202_v63 = vsub.f32 %v183_v42, %v191_v55 }
 0x133   :  { %v201_v59 = vsub.f32 %v199_v57, %v200_v58 }
 0x135   :  { %v203_v60 = vadd.f32 1e-05, %v201_v59 }
 0x137   :  { %617 = vrsqrt.f32 %v203_v60 }
 0x144   :  { %v618_v2 = vpop.eup %617 }
 0x145   :  { %v205_v3 = vmul.f32 %v618_v2, %v202_v63 }
 0x147   :  { %v210_v5 = vmul.f32 %v209_v1, %v205_v3 }
 0x149   :  { %v215_v6 = vadd.f32 %v214_v4, %v210_v5 }
 0x14b   :  { %570 = vmatmul.mubr.f32.vlgmr.msra.gmra.mxu1 %v215_v6 }
 0x20b   :  { %v303_v25 = vpop.f32.mrf.mxu1 }
 0x20c   :  { %v304_v26 = vadd.f32 %v303_v25, %v236_v24 }
 0x20d   :  { %v571_v27 = vpop.f32.mrf.mxu1 }
 0x20e   :  { %v307_v28 = vmax.f32 %v304_v26, 0.0 }
 0x210   :  { %v308_v29 = vrot.slane %v307_v28, 4  ;;  %v315_v30 = vmul.f32 %v307_v28, %v307_v28 }
 0x212   :  { %v309_v31 = vadd.f32 %v308_v29, %v307_v28  ;;  %v316_v32 = vrot.slane %v315_v30, 4 }
 0x214   :  { %v310_v33 = vrot.slane %v309_v31, 2  ;;  %v317_v34 = vadd.f32 %v316_v32, %v315_v30 }
 0x216   :  { %v311_v37 = vadd.f32 %v310_v33, %v309_v31  ;;  %v318_v0 = vrot.slane %v317_v34, 2 }
 0x218   :  { %v312_v38 = vrot.slane %v311_v37, 1  ;;  %v319_v39 = vadd.f32 %v318_v0, %v317_v34 }
 0x21a   :  { %v313_v40 = vadd.f32 %v312_v38, %v311_v37  ;;  %v320_v41 = vrot.slane %v319_v39, 1 }
 0x21c   :  { %v314_v42 = vmul.f32 0.125, %v313_v40  ;;  %v321_v43 = vadd.f32 %v320_v41, %v319_v39 }
 0x21e   :  { %v322_v44 = vmul.f32 0.125, %v321_v43  ;;  %v323_v36 = vmul.f32 %v314_v42, %v314_v42  ;;  %v325_v47 = vsub.f32 %v307_v28, %v314_v42 }
 0x220   :  { %v324_v45 = vsub.f32 %v322_v44, %v323_v36 }
 0x222   :  { %v326_v46 = vadd.f32 1e-05, %v324_v45 }
 0x224   :  { %619 = vrsqrt.f32 %v326_v46 }
 0x231   :  { %v620_v49 = vpop.eup %619 }
 0x232   :  { %v328_v50 = vmul.f32 %v620_v49, %v325_v47 }
 0x234   :  { %v333_v52 = vmul.f32 %v332_v48, %v328_v50 }
 0x236   :  { %v338_v53 = vadd.f32 %v337_v51, %v333_v52 }
 0x238   :  { %605 = vmatmul.mubr.f32.vlgmr.msra.gmra.mxu0 %v338_v53 }
 0x2f8   :  { %v428_v55 = vpop.f32.mrf.mxu0 }
 0x2f9   :  { %v429_v56 = vadd.f32 %v450_v54, %v428_v55 }
 0x2fa   :  { %v606_v57 = vpop.f32.mrf.mxu0 }
 0x2fb   :  { %432 = vst [vmem:[#allocation11] sm:$0xff] %v429_v56 }
 0x2fc   :  { %732 = shalt.err (!%p729_p1)
}
 0x2fd   :  { %442 = dma.vmem_to_hbm [thread:$0]  %s440_s27, 128, %s910_s7, [#allocation4]  }
 0x2fe   :  { %747 = dma.done.wait [#allocation4], 128  }
 0x2ff   :  { %748 = vsyncadd [#allocation4], 4294967168 }
 0x300   :  { %446 = vsyncpa [#allocation3], 1 }
 0x301   :  { %447 = vsyncpa [#allocation6], 1 }
 0x302   :  { %448 = vsyncpa [#allocation9], 1 }
 0x303   :  { %449 = vsyncpa [#allocation4], 1 }

</bundles_post_ra>
